<compile_context>
chip_gen: v5e
topology: v5e:2x2
jax: 0.10.0
libtpu: 0.0.40
codegen_flags: <defaults>
</compile_context>

<pallas_src>
import jax
import jax.numpy as jnp
from jax.experimental import pallas as pl
from jax.experimental.pallas import tpu as pltpu


def _round_up(n, m):
    return ((n + m - 1) // m) * m


def mlp_kernel(x_ref, w1_ref, b1_ref, w2_ref, b2_ref, o_ref):
    # x:(TM, D_in_p)  w1:(D_in_p, H)  b1:(1, H)  w2:(H, D_out_p)  b2:(1, D_out_p)
    x = x_ref[...]
    h = jnp.dot(x, w1_ref[...], preferred_element_type=jnp.float32) + b1_ref[...]
    h = jnp.maximum(h, 0.0)                       # ReLU (f32 VPU path, fast on v5e too)
    y = jnp.dot(h, w2_ref[...], preferred_element_type=jnp.float32) + b2_ref[...]
    o_ref[...] = y.astype(o_ref.dtype)


def my_sequential_forward(x, w1, b1, w2, b2, *, batch_tile=512):
    """Forward pass of MySequential(Linear(20,256), ReLU(), Linear(256,10))."""
    B, D_in = x.shape
    D_in_w, H = w1.shape
    H2, D_out = w2.shape
    assert D_in == D_in_w and H == H2

    # ---- pad to TPU-friendly shapes (zeros do not change the result) ----
    D_in_p = _round_up(D_in, 8)      # contraction dim: sublane multiple
    D_out_p = _round_up(D_out, 128)  # output dim: lane-dense store (big lever)
    B_p = _round_up(B, 8)            # batch: f32 sublane multiple

    x_p = jnp.pad(x, ((0, B_p - B), (0, D_in_p - D_in)))
    w1_p = jnp.pad(w1, ((0, D_in_p - D_in), (0, 0)))
    b1_p = b1                                             # (1, 256) already aligned
    w2_p = jnp.pad(w2, ((0, 0), (0, D_out_p - D_out)))
    b2_p = jnp.pad(b2, ((0, 0), (0, D_out_p - D_out)))

    # Advisory cost estimate so XLA can schedule around this tiny custom call.
    flops = 2 * B_p * (D_in_p * H + H * D_out_p)
    bytes_accessed = 4 * (x_p.size + w1_p.size + b1_p.size + w2_p.size
                          + b2_p.size + B_p * D_out_p)
    cost = pl.CostEstimate(flops=flops, transcendentals=0,
                           bytes_accessed=bytes_accessed)

    # NOTE(perf): at B=2 an XLA-fused jnp expression would beat any custom
    # call; the Pallas path earns its keep at large batch / when fused into a
    # bigger pipeline.  Kept per spec.
    # TODO(synk): on v6e/v7x, cast x/W1/W2 to bf16 (f32 accumulate) once the
    # call is MXU-bound at large batch; left in f32 here for exactness.

    if B_p <= batch_tile:
        # Grid-less call: whole (padded) problem fits trivially in VMEM, and a
        # 1-step grid would only add pipeline prologue/epilogue + double
        # buffers with zero overlap to show for it.
        vmem = pl.BlockSpec(memory_space=pltpu.MemorySpace.VMEM)
        out_p = pl.pallas_call(
            mlp_kernel,
            out_shape=jax.ShapeDtypeStruct((B_p, D_out_p), jnp.float32),
            in_specs=[vmem, vmem, vmem, vmem, vmem],
            out_specs=vmem,
            cost_estimate=cost,
        )(x_p, w1_p, b1_p, w2_p, b2_p)
        return out_p[:B, :D_out]

    # Large batch: tile only over batch.  Weights (~30 KB f32) stay resident
    # in VMEM (index_map returns block (0,0) every step); x / out tiles get
    # BlockSpec auto double-buffering so activation HBM traffic overlaps the
    # two matmuls.  batch_tile=512 keeps per-step VMEM well under v7x's
    # 64 MiB / 32 MiB-scoped budget (2 bufs x (512x32 + 512x128) f32 ~ 0.6 MiB).
    tm = batch_tile
    n_tiles = pl.cdiv(B_p, tm)
    B_full = n_tiles * tm
    if B_full != B_p:
        x_p = jnp.pad(x_p, ((0, B_full - B_p), (0, 0)))

    out_p = pl.pallas_call(
        mlp_kernel,
        out_shape=jax.ShapeDtypeStruct((B_full, D_out_p), jnp.float32),
        grid=(n_tiles,),
        in_specs=[
            pl.BlockSpec((tm, D_in_p), lambda i: (i, 0)),
            pl.BlockSpec((D_in_p, H), lambda i: (0, 0)),   # resident weights
            pl.BlockSpec((1, H), lambda i: (0, 0)),
            pl.BlockSpec((H, D_out_p), lambda i: (0, 0)),
            pl.BlockSpec((1, D_out_p), lambda i: (0, 0)),
        ],
        out_specs=pl.BlockSpec((tm, D_out_p), lambda i: (i, 0)),
        compiler_params=pltpu.CompilerParams(
            dimension_semantics=("parallel",)),   # v7x: shard batch over 2 TCs
        cost_estimate=cost,
    )(x_p, w1_p, b1_p, w2_p, b2_p)
    return out_p[:B, :D_out]


def init_params(key, d_in=20, d_hidden=256, d_out=10):
    # Deterministic init mimicking PyTorch nn.Linear default:
    # U(-1/sqrt(fan_in), 1/sqrt(fan_in)) for both weight and bias.
    k1, k2, k3, k4 = jax.random.split(key, 4)
    bound1 = 1.0 / jnp.sqrt(d_in)
    bound2 = 1.0 / jnp.sqrt(d_hidden)
    w1 = jax.random.uniform(k1, (d_in, d_hidden), jnp.float32, -bound1, bound1)
    b1 = jax.random.uniform(k2, (1, d_hidden), jnp.float32, -bound1, bound1)
    w2 = jax.random.uniform(k3, (d_hidden, d_out), jnp.float32, -bound2, bound2)
    b2 = jax.random.uniform(k4, (1, d_out), jnp.float32, -bound2, bound2)
    return w1, b1, w2, b2


if __name__ == "__main__":
    key = jax.random.PRNGKey(0)
    kx, kp = jax.random.split(key)

    # X = torch.rand(2, 20)  -> uniform [0, 1)
    x = jax.random.uniform(kx, (2, 20), jnp.float32)
    w1, b1, w2, b2 = init_params(kp)

    out = my_sequential_forward(x, w1, b1, w2, b2)
    out = jax.block_until_ready(out)

    # Pure-JAX reference check of the same forward pass.
    ref = jnp.maximum(x @ w1 + b1, 0.0) @ w2 + b2
    assert out.shape == (2, 10)
    assert jnp.allclose(out, ref, atol=1e-5, rtol=1e-5)

    # Also exercise the batch-tiled path once (correctness of the grid branch).
    xb = jax.random.uniform(kx, (1024, 20), jnp.float32)
    outb = jax.block_until_ready(my_sequential_forward(xb, w1, b1, w2, b2))
    refb = jnp.maximum(xb @ w1 + b1, 0.0) @ w2 + b2
    assert outb.shape == (1024, 10)
    assert jnp.allclose(outb, refb, atol=1e-4, rtol=1e-5)

    print("KERNEL_OK")
</pallas_src>

<mosaic_0001>
module attributes {stable_mosaic.version = 11 : i64} {
  func.func @mlp_kernel(%arg0: memref<8x24xf32, #tpu.memory_space<vmem>>, %arg1: memref<24x256xf32, #tpu.memory_space<vmem>>, %arg2: memref<1x256xf32, #tpu.memory_space<vmem>>, %arg3: memref<256x128xf32, #tpu.memory_space<vmem>>, %arg4: memref<1x128xf32, #tpu.memory_space<vmem>>, %arg5: memref<8x128xf32, #tpu.memory_space<vmem>>) attributes {dimension_semantics = [], scalar_prefetch = 0 : i64, scratch_operands = 0 : i64, tpu.core_type = #tpu.core_type<tc>} {
    %c0 = arith.constant 0 : index
    %c0_0 = arith.constant 0 : index
    %0 = vector.load %arg0[%c0, %c0_0] : memref<8x24xf32, #tpu.memory_space<vmem>>, vector<8x24xf32>
    %c0_1 = arith.constant 0 : index
    %c0_2 = arith.constant 0 : index
    %1 = vector.load %arg1[%c0_1, %c0_2] : memref<24x256xf32, #tpu.memory_space<vmem>>, vector<24x256xf32>
    %cst = arith.constant dense<0.000000e+00> : vector<8x256xf32>
    %2 = tpu.matmul %0, %1, %cst {dimension_numbers = #tpu.dot_dimension_numbers<[1], [0], [0], [1], [0, 0, 1, 1], [], []>} : vector<8x24xf32>, vector<24x256xf32>, vector<8x256xf32> -> vector<8x256xf32>
    %c0_3 = arith.constant 0 : index
    %c0_4 = arith.constant 0 : index
    %3 = vector.load %arg2[%c0_3, %c0_4] : memref<1x256xf32, #tpu.memory_space<vmem>>, vector<1x256xf32>
    %4 = vector.broadcast %3 : vector<1x256xf32> to vector<8x256xf32>
    %5 = arith.addf %2, %4 : vector<8x256xf32>
    %cst_5 = arith.constant 0.000000e+00 : f32
    %6 = vector.broadcast %cst_5 : f32 to vector<8x256xf32>
    %7 = arith.maximumf %5, %6 : vector<8x256xf32>
    %c0_6 = arith.constant 0 : index
    %c0_7 = arith.constant 0 : index
    %8 = vector.load %arg3[%c0_6, %c0_7] : memref<256x128xf32, #tpu.memory_space<vmem>>, vector<256x128xf32>
    %cst_8 = arith.constant dense<0.000000e+00> : vector<8x128xf32>
    %9 = tpu.matmul %7, %8, %cst_8 {dimension_numbers = #tpu.dot_dimension_numbers<[1], [0], [0], [1], [0, 0, 1, 1], [], []>} : vector<8x256xf32>, vector<256x128xf32>, vector<8x128xf32> -> vector<8x128xf32>
    %c0_9 = arith.constant 0 : index
    %c0_10 = arith.constant 0 : index
    %10 = vector.load %arg4[%c0_9, %c0_10] : memref<1x128xf32, #tpu.memory_space<vmem>>, vector<1x128xf32>
    %11 = vector.broadcast %10 : vector<1x128xf32> to vector<8x128xf32>
    %12 = arith.addf %9, %11 : vector<8x128xf32>
    %c0_11 = arith.constant 0 : index
    %c0_12 = arith.constant 0 : index
    %13 = vector.load %arg5[%c0_11, %c0_12] : memref<8x128xf32, #tpu.memory_space<vmem>>, vector<8x128xf32>
    tpu.vector_store %arg5[%c0_11, %c0_12], %12 {strides = array<i32>} : memref<8x128xf32, #tpu.memory_space<vmem>>, vector<8x128xf32>,
    return
  }
}

</mosaic_0001>

<bundles_post_ra>
// kernel: tpu_custom_call.1
= control target key start
LH: loop header
LB: loop body
LE: loop exit
PB: predicated region body
PF: predicated region fallthrough
CT: control target
= control target key end

     0   :  { %10 = vsyncpa [#allocation3], 0  ;;  %s432_s0 = inlined_call_operand.hbm [shape: f32[8,24], index: 0, kind: input, shape index: {}]   ;;  %s433_s1 = inlined_call_operand.hbm [shape: f32[24,256], index: 1, kind: input, shape index: {}]   ;;  %s434_s2 = inlined_call_operand.hbm [shape: f32[1,256], index: 2, kind: input, shape index: {}]   ;;  %s435_s3 = inlined_call_operand.hbm [shape: f32[256,128], index: 3, kind: input, shape index: {}]   ;;  %s436_s4 = inlined_call_operand.vmem [shape: f32[1,128], index: 4, kind: input, shape index: {}]   ;;  %s437_s5 = inlined_call_operand.hbm [shape: f32[8,128], index: 5, kind: output, shape index: {}]  }
   0x1   :  { %11 = vsyncpa [#allocation6], 0 }
   0x2   :  { %12 = vsyncpa [#allocation9], 0  ;;  %s29_s20 = sshll.u32 %s433_s1, 4  ;;  %s30_s20 = int_to_ptr.hbm [resolvable:$true] %s29_s20 }
   0x3   :  { %13 = vsyncpa [#allocation4], 0  ;;  %s375_s21 = smov [#allocation5]   ;;  %s19_s25 = sshll.u32 %s432_s0, 4  ;;  %s20_s25 = int_to_ptr.hbm [resolvable:$true] %s19_s25 }
   0x4   :  { %s31_s22 = sshll.u32 %s375_s21, 4  ;;  %s376_s26 = smov 256   ;;  %s32_s22 = int_to_ptr.vmem [resolvable:$true] %s31_s22 }
   0x5   :  { %s377_s27 = smov 16   ;;  %s378_s28 = smov [#allocation2]  }
   0x6   :  { %37 = dma.hbm_to_vmem [thread:$0]  %s30_s20, 768, %s32_s22, [#allocation6], %s376_s26, %s376_s26, %s377_s27  }
   0x7   :  { %s21_s29 = sshll.u32 %s378_s28, 4  ;;  %s43_s7 = sshll.u32 %s434_s2, 4  ;;  %s22_s29 = int_to_ptr.vmem [resolvable:$true] %s21_s29  ;;  %s44_s7 = int_to_ptr.hbm [resolvable:$true] %s43_s7 }
   0x8   :  { %24 = dma.hbm_to_vmem [thread:$0]  %s20_s25, 128, %s22_s29, [#allocation3]  }
   0x9   :  { %s53_s9 = sshll.u32 %s435_s3, 4  ;;  %s379_s10 = smov [#allocation7]   ;;  %s54_s9 = int_to_ptr.hbm [resolvable:$true] %s53_s9 }
   0xa   :  { %s45_s11 = sshll.u32 %s379_s10, 4  ;;  %s380_s0 = smov [#allocation8]   ;;  %s46_s11 = int_to_ptr.vmem [resolvable:$true] %s45_s11 }
   0xb   :  { %48 = dma.hbm_to_vmem [thread:$0]  %s44_s7, 32, %s46_s11, [#allocation6]  }
   0xc   :  { %s55_s12 = sshll.u32 %s380_s0, 4  ;;  %s381_s13 = smov 128   ;;  %s56_s12 = int_to_ptr.vmem [resolvable:$true] %s55_s12 }
   0xd   :  { %s382_s14 = smov 8  }
   0xe   :  { %61 = dma.hbm_to_vmem [thread:$0]  %s54_s9, 4096, %s56_s12, [#allocation9], %s381_s13, %s381_s13, %s382_s14  }
   0xf   :  { %367 = dma.done.wait [#allocation3], 128  }
  0x10   :  { %368 = vsyncadd [#allocation3], 4294967168 }
  0x11   :  { %369 = dma.done.wait [#allocation6], 800  }
  0x12   :  { %370 = vsyncadd [#allocation6], 4294966496 }
  0x13   :  { %371 = dma.done.wait [#allocation9], 4096  }
  0x14   :  { %372 = vsyncadd [#allocation9], 4294963200  ;;  %v85_v0 = vld [vmem:[#allocation5 + $0x20] sm:$0xff]  ;;  %v83_v1 = vld [vmem:[#allocation5 + $0x10] sm:$0xff]  ;;  %vm93_vm0 = vcmask 195584   ;;  %s383_s15 = smov [#allocation10]  }
  0x15   :  { %v86_v2 = vld [vmem:[#allocation5 + $0x28] sm:$0xff]  ;;  %110 = vmatpush.msra.mxu0 %v85_v0  ;;  %v84_v3 = vld [vmem:[#allocation5 + $0x18] sm:$0xff]  ;;  %v81_v4 = vld [vmem:[#allocation5] sm:$0xff]  ;;  %s221_s16 = sshll.u32 %s383_s15, 4  ;;  %s223_s19 = sshll.u32 %s437_s5, 4  ;;  %s222_s16 = int_to_ptr.vmem [resolvable:$true] %s221_s16  ;;  %s224_s19 = int_to_ptr.hbm [resolvable:$true] %s223_s19 }
  0x16   :  { %130 = vmatpush.msra.mxu1 %v86_v2  ;;  %v82_v5 = vld [vmem:[#allocation5 + $0x8] sm:$0xff]  ;;  %v80_v7 = vld [vmem:[#allocation2] sm:$0xff]  ;;  %v87_v39 = vld [vmem:[#allocation7] sm:$0x3] }
  0x17   :  { %v154_v6 = vld [vmem:[#allocation8 + $0x78] sm:$0xff]  ;;  %111 = vmatpush.msra.mxu0 %v83_v1  ;;  %v153_v9 = vld [vmem:[#allocation8 + $0x70] sm:$0xff]  ;;  %v152_v11 = vld [vmem:[#allocation8 + $0x68] sm:$0xff]  ;;  %v89_v40 = vperm.slane %v87_v39, 0  ;;  %v90_v41 = vperm.slane %v87_v39, 1 }
  0x18   :  { %131 = vmatpush.msra.mxu1 %v84_v3  ;;  %v170_v8 = vld [vmem:[#allocation8 + $0xf8] sm:$0xff]  ;;  %175 = vmatpush.msra.mxu2 %v154_v6  ;;  %v169_v10 = vld [vmem:[#allocation8 + $0xf0] sm:$0xff]  ;;  %v168_v12 = vld [vmem:[#allocation8 + $0xe8] sm:$0xff] }
  0x19   :  { %195 = vmatpush.msra.mxu3 %v170_v8  ;;  %112 = vmatpush.msra.mxu0 %v81_v4  ;;  %v151_v13 = vld [vmem:[#allocation8 + $0x60] sm:$0xff]  ;;  %v150_v15 = vld [vmem:[#allocation8 + $0x58] sm:$0xff]  ;;  %v149_v17 = vld [vmem:[#allocation8 + $0x50] sm:$0xff] }
  0x1a   :  { %132 = vmatpush.msra.mxu1 %v82_v5  ;;  %235 = vmatmul.msk.f32.vlgmr.msra.gmra.mxu0 %vm93_vm0, %v80_v7  ;;  %v167_v14 = vld [vmem:[#allocation8 + $0xe0] sm:$0xff]  ;;  %v166_v16 = vld [vmem:[#allocation8 + $0xd8] sm:$0xff]  ;;  %v165_v18 = vld [vmem:[#allocation8 + $0xd0] sm:$0xff] }
  0x1b   :  { %236 = vmatmul.msk.f32.vlgmr.msra.gmra.mxu1 %vm93_vm0, %v80_v7  ;;  %176 = vmatpush.msra.mxu2 %v153_v9  ;;  %v148_v19 = vld [vmem:[#allocation8 + $0x48] sm:$0xff]  ;;  %v147_v21 = vld [vmem:[#allocation8 + $0x40] sm:$0xff]  ;;  %v146_v23 = vld [vmem:[#allocation8 + $0x38] sm:$0xff] }
  0x1c   :  { %196 = vmatpush.msra.mxu3 %v169_v10  ;;  %v164_v20 = vld [vmem:[#allocation8 + $0xc8] sm:$0xff]  ;;  %v163_v22 = vld [vmem:[#allocation8 + $0xc0] sm:$0xff]  ;;  %v162_v24 = vld [vmem:[#allocation8 + $0xb8] sm:$0xff] }
  0x1d   :  { %177 = vmatpush.msra.mxu2 %v152_v11  ;;  %v145_v25 = vld [vmem:[#allocation8 + $0x30] sm:$0xff]  ;;  %v144_v27 = vld [vmem:[#allocation8 + $0x28] sm:$0xff]  ;;  %v143_v29 = vld [vmem:[#allocation8 + $0x20] sm:$0xff] }
  0x1e   :  { %197 = vmatpush.msra.mxu3 %v168_v12  ;;  %v161_v26 = vld [vmem:[#allocation8 + $0xb0] sm:$0xff]  ;;  %v160_v28 = vld [vmem:[#allocation8 + $0xa8] sm:$0xff]  ;;  %v159_v30 = vld [vmem:[#allocation8 + $0xa0] sm:$0xff] }
  0x1f   :  { %178 = vmatpush.msra.mxu2 %v151_v13  ;;  %v142_v31 = vld [vmem:[#allocation8 + $0x18] sm:$0xff]  ;;  %v141_v32 = vld [vmem:[#allocation8 + $0x10] sm:$0xff]  ;;  %v140_v34 = vld [vmem:[#allocation8 + $0x8] sm:$0xff] }
  0x20   :  { %198 = vmatpush.msra.mxu3 %v167_v14  ;;  %v158_v33 = vld [vmem:[#allocation8 + $0x98] sm:$0xff]  ;;  %v157_v35 = vld [vmem:[#allocation8 + $0x90] sm:$0xff]  ;;  %v139_v36 = vld [vmem:[#allocation8] sm:$0xff] }
  0x21   :  { %179 = vmatpush.msra.mxu2 %v150_v15  ;;  %v156_v37 = vld [vmem:[#allocation8 + $0x88] sm:$0xff]  ;;  %v155_v38 = vld [vmem:[#allocation8 + $0x80] sm:$0xff] }
  0x22   :  { %199 = vmatpush.msra.mxu3 %v166_v16  ;;  %v246_v48 = vld [vmem:[%s436_s4] ss:$0 sm:$0xff] }
  0x23   :  { %180 = vmatpush.msra.mxu2 %v149_v17 }
  0x24   :  { %200 = vmatpush.msra.mxu3 %v165_v18 }
  0x25   :  { %181 = vmatpush.msra.mxu2 %v148_v19 }
  0x26   :  { %201 = vmatpush.msra.mxu3 %v164_v20 }
  0x27   :  { %182 = vmatpush.msra.mxu2 %v147_v21 }
  0x28   :  { %202 = vmatpush.msra.mxu3 %v163_v22 }
  0x29   :  { %183 = vmatpush.msra.mxu2 %v146_v23 }
  0x2a   :  { %203 = vmatpush.msra.mxu3 %v162_v24 }
  0x2b   :  { %184 = vmatpush.msra.mxu2 %v145_v25 }
  0x2c   :  { %204 = vmatpush.msra.mxu3 %v161_v26 }
  0x2d   :  { %185 = vmatpush.msra.mxu2 %v144_v27 }
  0x2e   :  { %205 = vmatpush.msra.mxu3 %v160_v28 }
  0x2f   :  { %186 = vmatpush.msra.mxu2 %v143_v29 }
  0x30   :  { %206 = vmatpush.msra.mxu3 %v159_v30 }
  0x31   :  { %187 = vmatpush.msra.mxu2 %v142_v31 }
  0x32   :  { %207 = vmatpush.msra.mxu3 %v158_v33 }
  0x33   :  { %188 = vmatpush.msra.mxu2 %v141_v32 }
  0x34   :  { %208 = vmatpush.msra.mxu3 %v157_v35 }
  0x35   :  { %189 = vmatpush.msra.mxu2 %v140_v34 }
  0x36   :  { %209 = vmatpush.msra.mxu3 %v156_v37 }
  0x37   :  { %190 = vmatpush.msra.mxu2 %v139_v36 }
  0x38   :  { %210 = vmatpush.msra.mxu3 %v155_v38 }
  0x97   :  { %v114_v42 = vpop.f32.mrf.mxu0 }
  0x98   :  { %v134_v43 = vpop.f32.mrf.mxu1  ;;  %v115_v44 = vadd.f32 %v114_v42, %v89_v40 }
  0x99   :  { %v135_v45 = vadd.f32 %v134_v43, %v90_v41 }
  0x9a   :  { %v137_v46 = vmax.f32 %v115_v44, 0.0 }
  0x9b   :  { %v138_v47 = vmax.f32 %v135_v45, 0.0 }
  0x9c   :  { %191 = vmatmul.f32.vlgmr.msra.gmra.mxu2 %v137_v46 }
  0x9d   :  { %211 = vmatmul.f32.vlgmr.msra.gmra.mxu3 %v138_v47 }
 0x11f   :  { %v192_v49 = vpop.f32.mrf.mxu2 }
 0x120   :  { %v212_v50 = vpop.f32.mrf.mxu3  ;;  %v193_v51 = vadd.f32 %v246_v48, %v192_v49 }
 0x122   :  { %v213_v52 = vadd.f32 %v212_v50, %v193_v51 }
 0x124   :  { %215 = vst [vmem:[#allocation10] sm:$0xff] %v213_v52 }
 0x125   :  { %226 = dma.vmem_to_hbm [thread:$0]  %s222_s16, 128, %s224_s19, [#allocation4]  }
 0x126   :  { %373 = dma.done.wait [#allocation4], 128  }
 0x127   :  { %374 = vsyncadd [#allocation4], 4294967168 }
 0x128   :  { %231 = vsyncpa [#allocation3], 1 }
 0x129   :  { %232 = vsyncpa [#allocation6], 1 }
 0x12a   :  { %233 = vsyncpa [#allocation9], 1 }
 0x12b   :  { %234 = vsyncpa [#allocation4], 1 }

</bundles_post_ra>
